<compile_context>
chip_gen: v6e
topology: v6e:2x2x1
jax: 0.10.0
libtpu: 0.0.40
codegen_flags: <defaults>
</compile_context>

<pallas_src>
import functools

import jax
import jax.numpy as jnp
from jax.experimental import pallas as pl
from jax.experimental.pallas import tpu as pltpu


def _round_up(x, m):
    return (x + m - 1) // m * m


# -----------------------------------------------------------------------------
# PreNorm + FeedForward (+ residual) kernel
# -----------------------------------------------------------------------------
def _prenorm_ffn_kernel(x_ref, g_ref, bt_ref, w1_ref, b1_ref, w2_ref, b2_ref,
                        o_ref, ln_ref, acc_ref, *, inv_dim, eps):
    k = pl.program_id(1)

    @pl.when(k == 0)
    def _():
        # LayerNorm over the true feature width (padded cols are zero; use E[x^2]-m^2
        # so zero-padding never perturbs the statistics). Padded gamma/beta are zero.
        xv = x_ref[...].astype(jnp.float32)
        mean = jnp.sum(xv, axis=-1, keepdims=True) * inv_dim
        ex2 = jnp.sum(xv * xv, axis=-1, keepdims=True) * inv_dim
        inv = jax.lax.rsqrt(ex2 - mean * mean + eps)
        ln = (xv - mean) * inv * g_ref[...] + bt_ref[...]
        ln_ref[...] = ln.astype(ln_ref.dtype)
        acc_ref[...] = jnp.zeros_like(acc_ref)

    # First matmul over this hidden slab (bf16 operands, f32 accumulate) + bias + exact GELU.
    h = jnp.dot(ln_ref[...], w1_ref[...], preferred_element_type=jnp.float32)
    h = h + b1_ref[...]
    h = jax.nn.gelu(h, approximate=False)          # exact erf GELU, f32 epilogue
    # Dropout(p=0.0) is the identity -> nothing to do.
    acc_ref[...] += jnp.dot(h.astype(w2_ref.dtype), w2_ref[...],
                            preferred_element_type=jnp.float32)

    @pl.when(k == pl.num_programs(1) - 1)
    def _():
        out = acc_ref[...] + b2_ref[...] + x_ref[...].astype(jnp.float32)   # + residual
        o_ref[...] = out.astype(o_ref.dtype)


def prenorm_feed_forward(x, gamma, beta, w1, b1, w2, b2, *, eps=1e-5,
                         compute_dtype=jnp.bfloat16, tm=256, th=512):
    """x: [B,S,dim]; w1: [dim,hidden]; w2: [hidden,dim]; computes x + FFN(LN(x))."""
    B, S, dim = x.shape
    hidden = w1.shape[1]
    M = B * S

    dim_p = _round_up(dim, 128)                        # lane-dense output stores
    th_eff = min(th, _round_up(hidden, 128))           # hidden (reduction) tile
    hidden_p = _round_up(hidden, th_eff)
    tm_eff = min(tm, _round_up(M, 8))                  # large row tile, clamped for tiny inputs
    M_p = _round_up(M, tm_eff)                         # pad instead of asserting divisibility

    x2d = jnp.pad(x.reshape(M, dim), ((0, M_p - M), (0, dim_p - dim)))
    g_p = jnp.pad(gamma.reshape(1, dim), ((0, 0), (0, dim_p - dim)))
    bt_p = jnp.pad(beta.reshape(1, dim), ((0, 0), (0, dim_p - dim)))
    w1_p = jnp.pad(w1.astype(compute_dtype), ((0, dim_p - dim), (0, hidden_p - hidden)))
    b1_p = jnp.pad(b1.reshape(1, hidden), ((0, 0), (0, hidden_p - hidden)))
    w2_p = jnp.pad(w2.astype(compute_dtype), ((0, hidden_p - hidden), (0, dim_p - dim)))
    b2_p = jnp.pad(b2.reshape(1, dim), ((0, 0), (0, dim_p - dim)))

    def nbytes(a):
        return a.size * a.dtype.itemsize

    cost = pl.CostEstimate(
        flops=int(4 * M_p * dim_p * hidden_p),
        transcendentals=int(M_p * hidden_p),
        bytes_accessed=int(2 * nbytes(x2d) + nbytes(w1_p) + nbytes(w2_p)
                           + nbytes(b1_p) + nbytes(b2_p) + nbytes(g_p) + nbytes(bt_p)),
    )

    kernel = functools.partial(_prenorm_ffn_kernel, inv_dim=1.0 / dim, eps=eps)

    out2d = pl.pallas_call(
        kernel,
        out_shape=jax.ShapeDtypeStruct((M_p, dim_p), x.dtype),
        grid_spec=pltpu.PrefetchScalarGridSpec(
            num_scalar_prefetch=0,
            grid=(M_p // tm_eff, hidden_p // th_eff),   # reduction axis last
            in_specs=[
                pl.BlockSpec((tm_eff, dim_p), lambda i, k: (i, 0)),   # x row tile
                pl.BlockSpec((1, dim_p), lambda i, k: (0, 0)),        # LN gamma
                pl.BlockSpec((1, dim_p), lambda i, k: (0, 0)),        # LN beta
                pl.BlockSpec((dim_p, th_eff), lambda i, k: (0, k)),   # W1 hidden slab
                pl.BlockSpec((1, th_eff), lambda i, k: (0, k)),       # b1 hidden slab
                pl.BlockSpec((th_eff, dim_p), lambda i, k: (k, 0)),   # W2 hidden slab
                pl.BlockSpec((1, dim_p), lambda i, k: (0, 0)),        # b2
            ],
            out_specs=pl.BlockSpec((tm_eff, dim_p), lambda i, k: (i, 0)),
            scratch_shapes=[
                pltpu.VMEM((tm_eff, dim_p), compute_dtype),   # LN(x) tile (matmul operand)
                pltpu.VMEM((tm_eff, dim_p), jnp.float32),     # f32 accumulator
            ],
        ),
        compiler_params=pltpu.CompilerParams(
            dimension_semantics=("parallel", "arbitrary"),
            vmem_limit_bytes=48 * 1024 * 1024,   # sized so tiles also fit v7x's 64 MiB VMEM
        ),
        cost_estimate=cost,
    )(x2d, g_p, bt_p, w1_p, b1_p, w2_p, b2_p)

    return out2d[:M, :dim].reshape(B, S, dim)


# -----------------------------------------------------------------------------
# PreNorm + Attention (+ residual) kernel (grid over batch, static loop over heads)
# -----------------------------------------------------------------------------
def _prenorm_attn_kernel(x_ref, g_ref, bt_ref, wq_ref, wk_ref, wv_ref, wo_ref,
                         bo_ref, o_ref, *, head_num, d_head, scale, inv_dim, eps,
                         compute_dtype):
    # LayerNorm over the true feature width (padded cols of x / gamma / beta are zero).
    x = x_ref[...].astype(jnp.float32)                              # (S, dim_p)
    mean = jnp.sum(x, axis=-1, keepdims=True) * inv_dim
    ex2 = jnp.sum(x * x, axis=-1, keepdims=True) * inv_dim
    ln = (x - mean) * jax.lax.rsqrt(ex2 - mean * mean + eps) * g_ref[...] + bt_ref[...]
    lnc = ln.astype(compute_dtype)

    q = jnp.dot(lnc, wq_ref[...], preferred_element_type=jnp.float32)   # (S, inner)
    k = jnp.dot(lnc, wk_ref[...], preferred_element_type=jnp.float32)
    v = jnp.dot(lnc, wv_ref[...], preferred_element_type=jnp.float32)
    wo = wo_ref[...]                                                     # (inner, dim_p)

    acc = jnp.zeros((x.shape[0], wo.shape[1]), jnp.float32)
    for h in range(head_num):                      # static unroll over heads
        sl = slice(h * d_head, (h + 1) * d_head)
        qh = q[:, sl].astype(compute_dtype)
        kh = k[:, sl].astype(compute_dtype)
        vh = v[:, sl].astype(compute_dtype)
        dots = jax.lax.dot_general(qh, kh, (((1,), (1,)), ((), ())),
                                   preferred_element_type=jnp.float32) * scale
        dots = dots - jnp.max(dots, axis=-1, keepdims=True)
        p = jnp.exp(dots)
        p = p * pl.reciprocal(jnp.sum(p, axis=-1, keepdims=True), approx=True)
        oh = jnp.dot(p.astype(compute_dtype), vh, preferred_element_type=jnp.float32)
        # output projection, accumulated per head: concat(out_h) @ Wo == sum_h out_h @ Wo[h*d:(h+1)*d]
        acc = acc + jnp.dot(oh.astype(compute_dtype), wo[sl, :],
                            preferred_element_type=jnp.float32)

    o_ref[...] = (acc + bo_ref[...] + x).astype(o_ref.dtype)            # + bias + residual


def prenorm_attention(x, gamma, beta, wq, wk, wv, wo, bo, *, head_num, head_dim,
                      eps=1e-5, compute_dtype=jnp.bfloat16):
    """x: [B,S,dim]; computes x + to_out(Attention(LN(x))) with inner_dim = head_dim (as in the spec)."""
    B, S, dim = x.shape
    inner = head_dim
    assert head_dim % head_num == 0

    dim_p = _round_up(dim, 128)          # lane-dense output stores; zero padding is math-neutral
    pad_d = dim_p - dim
    x_p = jnp.pad(x, ((0, 0), (0, 0), (0, pad_d)))
    g_p = jnp.pad(gamma.reshape(1, dim), ((0, 0), (0, pad_d)))
    bt_p = jnp.pad(beta.reshape(1, dim), ((0, 0), (0, pad_d)))
    wq_p = jnp.pad(wq.astype(compute_dtype), ((0, pad_d), (0, 0)))
    wk_p = jnp.pad(wk.astype(compute_dtype), ((0, pad_d), (0, 0)))
    wv_p = jnp.pad(wv.astype(compute_dtype), ((0, pad_d), (0, 0)))
    wo_p = jnp.pad(wo.astype(compute_dtype), ((0, 0), (0, pad_d)))
    bo_p = jnp.pad(bo.reshape(1, dim), ((0, 0), (0, pad_d)))

    def nbytes(a):
        return a.size * a.dtype.itemsize

    cost = pl.CostEstimate(
        flops=int(B * (6 * S * dim_p * inner          # QKV projections
                       + 4 * S * S * inner            # QK^T and PV over all heads
                       + 2 * S * inner * dim_p)),     # output projection
        transcendentals=int(B * head_num * S * S),
        bytes_accessed=int(2 * nbytes(x_p) + nbytes(wq_p) + nbytes(wk_p) + nbytes(wv_p)
                           + nbytes(wo_p) + nbytes(bo_p) + nbytes(g_p) + nbytes(bt_p)),
    )

    kernel = functools.partial(
        _prenorm_attn_kernel, head_num=head_num, d_head=head_dim // head_num,
        scale=float(head_dim) ** -0.5, inv_dim=1.0 / dim, eps=eps,
        compute_dtype=compute_dtype)

    out = pl.pallas_call(
        kernel,
        out_shape=jax.ShapeDtypeStruct((B, S, dim_p), x.dtype),
        grid_spec=pltpu.PrefetchScalarGridSpec(
            num_scalar_prefetch=0,
            grid=(B,),
            in_specs=[
                pl.BlockSpec((None, S, dim_p), lambda b: (b, 0, 0)),   # x (batch squeezed)
                pl.BlockSpec((1, dim_p), lambda b: (0, 0)),            # LN gamma
                pl.BlockSpec((1, dim_p), lambda b: (0, 0)),            # LN beta
                pl.BlockSpec((dim_p, inner), lambda b: (0, 0)),        # Wq
                pl.BlockSpec((dim_p, inner), lambda b: (0, 0)),        # Wk
                pl.BlockSpec((dim_p, inner), lambda b: (0, 0)),        # Wv
                pl.BlockSpec((inner, dim_p), lambda b: (0, 0)),        # Wo
                pl.BlockSpec((1, dim_p), lambda b: (0, 0)),            # bo
            ],
            out_specs=pl.BlockSpec((None, S, dim_p), lambda b: (b, 0, 0)),
        ),
        compiler_params=pltpu.CompilerParams(
            dimension_semantics=("parallel",),
            vmem_limit_bytes=48 * 1024 * 1024,
        ),
        cost_estimate=cost,
    )(x_p, g_p, bt_p, wq_p, wk_p, wv_p, wo_p, bo_p)

    return out[:, :, :dim]


# -----------------------------------------------------------------------------
# Full Transformer forward (Python loop over layers, Pallas kernels inside)
# -----------------------------------------------------------------------------
def transformer_forward(x, layers, *, head_num, head_dim, eps=1e-5,
                        compute_dtype=jnp.bfloat16, tm=256, th=512):
    for p in layers:
        x = prenorm_attention(x, p["ag"], p["ab"], p["wq"], p["wk"], p["wv"],
                              p["wo"], p["bo"], head_num=head_num, head_dim=head_dim,
                              eps=eps, compute_dtype=compute_dtype)
        x = prenorm_feed_forward(x, p["fg"], p["fb"], p["w1"], p["b1"], p["w2"], p["b2"],
                                 eps=eps, compute_dtype=compute_dtype, tm=tm, th=th)
    return x


# -----------------------------------------------------------------------------
# Pure-JAX reference (mirrors the kernel's bf16-operand / f32-accumulate recipe)
# -----------------------------------------------------------------------------
def _layernorm_ref(x, g, b, eps):
    m = jnp.mean(x, axis=-1, keepdims=True)
    ex2 = jnp.mean(x * x, axis=-1, keepdims=True)
    return (x - m) * jax.lax.rsqrt(ex2 - m * m + eps) * g + b


def _attention_ref(x, p, head_num, head_dim, eps, cd):
    B, S, dim = x.shape
    d = head_dim // head_num
    scale = float(head_dim) ** -0.5
    lnc = _layernorm_ref(x, p["ag"], p["ab"], eps).astype(cd)
    q = jnp.dot(lnc, p["wq"], preferred_element_type=jnp.float32)
    k = jnp.dot(lnc, p["wk"], preferred_element_type=jnp.float32)
    v = jnp.dot(lnc, p["wv"], preferred_element_type=jnp.float32)
    qh = q.reshape(B, S, head_num, d).astype(cd)
    kh = k.reshape(B, S, head_num, d).astype(cd)
    vh = v.reshape(B, S, head_num, d).astype(cd)
    dots = jnp.einsum("bnhd,bmhd->bhnm", qh, kh, preferred_element_type=jnp.float32) * scale
    dots = dots - jnp.max(dots, axis=-1, keepdims=True)
    probs = jnp.exp(dots)
    probs = probs / jnp.sum(probs, axis=-1, keepdims=True)
    o = jnp.einsum("bhnm,bmhd->bnhd", probs.astype(cd), vh, preferred_element_type=jnp.float32)
    o = o.reshape(B, S, head_num * d)
    out = jnp.dot(o.astype(cd), p["wo"], preferred_element_type=jnp.float32) + p["bo"]
    return out + x


def _ffn_ref(x, p, eps, cd):
    ln = _layernorm_ref(x, p["fg"], p["fb"], eps).astype(cd)
    h = jnp.dot(ln, p["w1"], preferred_element_type=jnp.float32) + p["b1"]
    h = jax.nn.gelu(h, approximate=False)
    out = jnp.dot(h.astype(cd), p["w2"], preferred_element_type=jnp.float32) + p["b2"]
    return out + x


def transformer_ref(x, layers, *, head_num, head_dim, eps=1e-5, compute_dtype=jnp.bfloat16):
    for p in layers:
        x = _attention_ref(x, p, head_num, head_dim, eps, compute_dtype)
        x = _ffn_ref(x, p, eps, compute_dtype)
    return x


if __name__ == "__main__":
    # Small shapes consistent with the module; note the spec sets inner_dim = head_dim.
    B, S, dim = 2, 8, 32
    head_num, head_dim, mlp_dim, depth = 4, 32, 64, 2
    cd = jnp.bfloat16

    key = jax.random.PRNGKey(0)
    key, kx = jax.random.split(key)
    x = jax.random.normal(kx, (B, S, dim), dtype=jnp.float32)

    def linear(k, fan_in, shape):
        lim = 1.0 / float(fan_in) ** 0.5
        return jax.random.uniform(k, shape, jnp.float32, -lim, lim)

    inner = head_dim
    project_out = not (head_num == 1 and head_dim == dim)

    layers = []
    for _ in range(depth):
        key, *ks = jax.random.split(key, 15)
        if project_out:
            wo = linear(ks[5], inner, (inner, dim))
            bo = linear(ks[6], inner, (1, dim))
        else:
            wo = jnp.eye(inner, dtype=jnp.float32)          # to_out = Identity
            bo = jnp.zeros((1, dim), jnp.float32)
        layers.append({
            "ag": 1.0 + 0.05 * jax.random.normal(ks[0], (1, dim), jnp.float32),
            "ab": 0.05 * jax.random.normal(ks[1], (1, dim), jnp.float32),
            "wq": linear(ks[2], dim, (dim, inner)).astype(cd),   # columns of to_qkv (bias=False)
            "wk": linear(ks[3], dim, (dim, inner)).astype(cd),
            "wv": linear(ks[4], dim, (dim, inner)).astype(cd),
            "wo": wo.astype(cd),
            "bo": bo,
            "fg": 1.0 + 0.05 * jax.random.normal(ks[7], (1, dim), jnp.float32),
            "fb": 0.05 * jax.random.normal(ks[8], (1, dim), jnp.float32),
            "w1": linear(ks[9], dim, (dim, mlp_dim)).astype(cd),
            "b1": linear(ks[10], dim, (1, mlp_dim)),
            "w2": linear(ks[11], mlp_dim, (mlp_dim, dim)).astype(cd),
            "b2": linear(ks[12], mlp_dim, (1, dim)),
        })

    out = transformer_forward(x, layers, head_num=head_num, head_dim=head_dim, compute_dtype=cd)
    out = jax.block_until_ready(out)

    ref = transformer_ref(x, layers, head_num=head_num, head_dim=head_dim, compute_dtype=cd)
    assert out.shape == (B, S, dim)
    max_err = jnp.max(jnp.abs(out - ref))
    assert jnp.allclose(out, ref, atol=3e-2, rtol=3e-2), f"mismatch vs reference, max|diff|={max_err}"

    print("KERNEL_OK")
</pallas_src>

<mosaic_0001>
module attributes {stable_mosaic.version = 11 : i64} {
  func.func @_prenorm_attn_kernel(%arg0: i32, %arg1: memref<1x8x128xf32, #tpu.memory_space<vmem>>, %arg2: memref<1x128xf32, #tpu.memory_space<vmem>>, %arg3: memref<1x128xf32, #tpu.memory_space<vmem>>, %arg4: memref<128x32xbf16, #tpu.memory_space<vmem>>, %arg5: memref<128x32xbf16, #tpu.memory_space<vmem>>, %arg6: memref<128x32xbf16, #tpu.memory_space<vmem>>, %arg7: memref<32x128xbf16, #tpu.memory_space<vmem>>, %arg8: memref<1x128xf32, #tpu.memory_space<vmem>>, %arg9: memref<1x8x128xf32, #tpu.memory_space<vmem>>) attributes {dimension_semantics = [#tpu.dimension_semantics<parallel>], iteration_bounds = array<i64: 2>, scalar_prefetch = 0 : i64, scratch_operands = 0 : i64, tpu.core_type = #tpu.core_type<tc>, window_params = [{transform_indices = @transform_0, window_bounds = array<i64: 1, 8, 128>}, {pipeline_mode = #tpu.pipeline_mode<synchronous>, transform_indices = @transform_1, window_bounds = array<i64: 1, 128>}, {pipeline_mode = #tpu.pipeline_mode<synchronous>, transform_indices = @transform_2, window_bounds = array<i64: 1, 128>}, {pipeline_mode = #tpu.pipeline_mode<synchronous>, transform_indices = @transform_3, window_bounds = array<i64: 128, 32>}, {pipeline_mode = #tpu.pipeline_mode<synchronous>, transform_indices = @transform_4, window_bounds = array<i64: 128, 32>}, {pipeline_mode = #tpu.pipeline_mode<synchronous>, transform_indices = @transform_5, window_bounds = array<i64: 128, 32>}, {pipeline_mode = #tpu.pipeline_mode<synchronous>, transform_indices = @transform_6, window_bounds = array<i64: 32, 128>}, {pipeline_mode = #tpu.pipeline_mode<synchronous>, transform_indices = @transform_7, window_bounds = array<i64: 1, 128>}, {transform_indices = @transform_8, window_bounds = array<i64: 1, 8, 128>}]} {
    %c0 = arith.constant 0 : index
    %c0_0 = arith.constant 0 : index
    %c0_1 = arith.constant 0 : index
    %0 = vector.load %arg1[%c0, %c0_0, %c0_1] : memref<1x8x128xf32, #tpu.memory_space<vmem>>, vector<1x8x128xf32>
    %1 = vector.shape_cast %0 : vector<1x8x128xf32> to vector<8x128xf32>
    %cst = arith.constant dense<0.000000e+00> : vector<8xf32>
    %2 = vector.multi_reduction <add>, %1, %cst [1] : vector<8x128xf32> to vector<8xf32>
    %3 = vector.shape_cast %2 : vector<8xf32> to vector<8x1xf32>
    %cst_2 = arith.constant 3.125000e-02 : f32
    %4 = vector.broadcast %cst_2 : f32 to vector<8x1xf32>
    %5 = arith.mulf %3, %4 : vector<8x1xf32>
    %6 = arith.mulf %1, %1 : vector<8x128xf32>
    %cst_3 = arith.constant dense<0.000000e+00> : vector<8xf32>
    %7 = vector.multi_reduction <add>, %6, %cst_3 [1] : vector<8x128xf32> to vector<8xf32>
    %8 = vector.shape_cast %7 : vector<8xf32> to vector<8x1xf32>
    %cst_4 = arith.constant 3.125000e-02 : f32
    %9 = vector.broadcast %cst_4 : f32 to vector<8x1xf32>
    %10 = arith.mulf %8, %9 : vector<8x1xf32>
    %11 = vector.broadcast %5 : vector<8x1xf32> to vector<8x128xf32>
    %12 = arith.subf %1, %11 : vector<8x128xf32>
    %13 = arith.mulf %5, %5 : vector<8x1xf32>
    %14 = arith.subf %10, %13 : vector<8x1xf32>
    %cst_5 = arith.constant 9.99999974E-6 : f32
    %15 = vector.broadcast %cst_5 : f32 to vector<8x1xf32>
    %16 = arith.addf %14, %15 : vector<8x1xf32>
    %17 = math.rsqrt %16 : vector<8x1xf32>
    %18 = vector.broadcast %17 : vector<8x1xf32> to vector<8x128xf32>
    %19 = arith.mulf %12, %18 : vector<8x128xf32>
    %c0_6 = arith.constant 0 : index
    %c0_7 = arith.constant 0 : index
    %20 = vector.load %arg2[%c0_6, %c0_7] : memref<1x128xf32, #tpu.memory_space<vmem>>, vector<1x128xf32>
    %21 = vector.broadcast %20 : vector<1x128xf32> to vector<8x128xf32>
    %22 = arith.mulf %19, %21 : vector<8x128xf32>
    %c0_8 = arith.constant 0 : index
    %c0_9 = arith.constant 0 : index
    %23 = vector.load %arg3[%c0_8, %c0_9] : memref<1x128xf32, #tpu.memory_space<vmem>>, vector<1x128xf32>
    %24 = vector.broadcast %23 : vector<1x128xf32> to vector<8x128xf32>
    %25 = arith.addf %22, %24 : vector<8x128xf32>
    %26 = arith.truncf %25 : vector<8x128xf32> to vector<8x128xbf16>
    %c0_10 = arith.constant 0 : index
    %c0_11 = arith.constant 0 : index
    %27 = vector.load %arg4[%c0_10, %c0_11] : memref<128x32xbf16, #tpu.memory_space<vmem>>, vector<128x32xbf16>
    %cst_12 = arith.constant dense<0.000000e+00> : vector<8x32xf32>
    %28 = tpu.matmul %26, %27, %cst_12 {dimension_numbers = #tpu.dot_dimension_numbers<[1], [0], [0], [1], [0, 0, 1, 1], [], []>} : vector<8x128xbf16>, vector<128x32xbf16>, vector<8x32xf32> -> vector<8x32xf32>
    %c0_13 = arith.constant 0 : index
    %c0_14 = arith.constant 0 : index
    %29 = vector.load %arg5[%c0_13, %c0_14] : memref<128x32xbf16, #tpu.memory_space<vmem>>, vector<128x32xbf16>
    %cst_15 = arith.constant dense<0.000000e+00> : vector<8x32xf32>
    %30 = tpu.matmul %26, %29, %cst_15 {dimension_numbers = #tpu.dot_dimension_numbers<[1], [0], [0], [1], [0, 0, 1, 1], [], []>} : vector<8x128xbf16>, vector<128x32xbf16>, vector<8x32xf32> -> vector<8x32xf32>
    %c0_16 = arith.constant 0 : index
    %c0_17 = arith.constant 0 : index
    %31 = vector.load %arg6[%c0_16, %c0_17] : memref<128x32xbf16, #tpu.memory_space<vmem>>, vector<128x32xbf16>
    %cst_18 = arith.constant dense<0.000000e+00> : vector<8x32xf32>
    %32 = tpu.matmul %26, %31, %cst_18 {dimension_numbers = #tpu.dot_dimension_numbers<[1], [0], [0], [1], [0, 0, 1, 1], [], []>} : vector<8x128xbf16>, vector<128x32xbf16>, vector<8x32xf32> -> vector<8x32xf32>
    %c0_19 = arith.constant 0 : index
    %c0_20 = arith.constant 0 : index
    %33 = vector.load %arg7[%c0_19, %c0_20] : memref<32x128xbf16, #tpu.memory_space<vmem>>, vector<32x128xbf16>
    %cst_21 = arith.constant 0.000000e+00 : f32
    %34 = vector.broadcast %cst_21 : f32 to vector<8x128xf32>
    %35 = vector.extract_strided_slice %28 {offsets = [0, 0], sizes = [8, 8], strides = [1, 1]} : vector<8x32xf32> to vector<8x8xf32>
    %36 = arith.truncf %35 : vector<8x8xf32> to vector<8x8xbf16>
    %37 = vector.extract_strided_slice %30 {offsets = [0, 0], sizes = [8, 8], strides = [1, 1]} : vector<8x32xf32> to vector<8x8xf32>
    %38 = arith.truncf %37 : vector<8x8xf32> to vector<8x8xbf16>
    %39 = vector.extract_strided_slice %32 {offsets = [0, 0], sizes = [8, 8], strides = [1, 1]} : vector<8x32xf32> to vector<8x8xf32>
    %40 = arith.truncf %39 : vector<8x8xf32> to vector<8x8xbf16>
    %cst_22 = arith.constant dense<0.000000e+00> : vector<8x8xf32>
    %41 = tpu.matmul %36, %38, %cst_22 {dimension_numbers = #tpu.dot_dimension_numbers<[1], [1], [0], [0], [0, 0, 1, 0], [], []>} : vector<8x8xbf16>, vector<8x8xbf16>, vector<8x8xf32> -> vector<8x8xf32>
    %cst_23 = arith.constant 0.176776692 : f32
    %42 = vector.broadcast %cst_23 : f32 to vector<8x8xf32>
    %43 = arith.mulf %41, %42 : vector<8x8xf32>
    %cst_24 = arith.constant dense<0xFF800000> : vector<8xf32>
    %44 = vector.multi_reduction <maximumf>, %43, %cst_24 [1] : vector<8x8xf32> to vector<8xf32>
    %45 = vector.shape_cast %44 : vector<8xf32> to vector<8x1xf32>
    %46 = vector.broadcast %45 : vector<8x1xf32> to vector<8x8xf32>
    %47 = arith.subf %43, %46 : vector<8x8xf32>
    %48 = math.exp %47 : vector<8x8xf32>
    %cst_25 = arith.constant dense<0.000000e+00> : vector<8xf32>
    %49 = vector.multi_reduction <add>, %48, %cst_25 [1] : vector<8x8xf32> to vector<8xf32>
    %50 = vector.shape_cast %49 : vector<8xf32> to vector<8x1xf32>
    %51 = tpu.reciprocal %50 {approx = true} : vector<8x1xf32> -> vector<8x1xf32>
    %52 = vector.broadcast %51 : vector<8x1xf32> to vector<8x8xf32>
    %53 = arith.mulf %48, %52 : vector<8x8xf32>
    %54 = arith.truncf %53 : vector<8x8xf32> to vector<8x8xbf16>
    %cst_26 = arith.constant dense<0.000000e+00> : vector<8x8xf32>
    %55 = tpu.matmul %54, %40, %cst_26 {dimension_numbers = #tpu.dot_dimension_numbers<[1], [0], [0], [1], [0, 0, 1, 1], [], []>} : vector<8x8xbf16>, vector<8x8xbf16>, vector<8x8xf32> -> vector<8x8xf32>
    %56 = arith.truncf %55 : vector<8x8xf32> to vector<8x8xbf16>
    %57 = vector.extract_strided_slice %33 {offsets = [0, 0], sizes = [8, 128], strides = [1, 1]} : vector<32x128xbf16> to vector<8x128xbf16>
    %cst_27 = arith.constant dense<0.000000e+00> : vector<8x128xf32>
    %58 = tpu.matmul %56, %57, %cst_27 {dimension_numbers = #tpu.dot_dimension_numbers<[1], [0], [0], [1], [0, 0, 1, 1], [], []>} : vector<8x8xbf16>, vector<8x128xbf16>, vector<8x128xf32> -> vector<8x128xf32>
    %59 = arith.addf %34, %58 : vector<8x128xf32>
    %60 = vector.extract_strided_slice %28 {offsets = [0, 8], sizes = [8, 8], strides = [1, 1]} : vector<8x32xf32> to vector<8x8xf32>
    %61 = arith.truncf %60 : vector<8x8xf32> to vector<8x8xbf16>
    %62 = vector.extract_strided_slice %30 {offsets = [0, 8], sizes = [8, 8], strides = [1, 1]} : vector<8x32xf32> to vector<8x8xf32>
    %63 = arith.truncf %62 : vector<8x8xf32> to vector<8x8xbf16>
    %64 = vector.extract_strided_slice %32 {offsets = [0, 8], sizes = [8, 8], strides = [1, 1]} : vector<8x32xf32> to vector<8x8xf32>
    %65 = arith.truncf %64 : vector<8x8xf32> to vector<8x8xbf16>
    %cst_28 = arith.constant dense<0.000000e+00> : vector<8x8xf32>
    %66 = tpu.matmul %61, %63, %cst_28 {dimension_numbers = #tpu.dot_dimension_numbers<[1], [1], [0], [0], [0, 0, 1, 0], [], []>} : vector<8x8xbf16>, vector<8x8xbf16>, vector<8x8xf32> -> vector<8x8xf32>
    %cst_29 = arith.constant 0.176776692 : f32
    %67 = vector.broadcast %cst_29 : f32 to vector<8x8xf32>
    %68 = arith.mulf %66, %67 : vector<8x8xf32>
    %cst_30 = arith.constant dense<0xFF800000> : vector<8xf32>
    %69 = vector.multi_reduction <maximumf>, %68, %cst_30 [1] : vector<8x8xf32> to vector<8xf32>
    %70 = vector.shape_cast %69 : vector<8xf32> to vector<8x1xf32>
    %71 = vector.broadcast %70 : vector<8x1xf32> to vector<8x8xf32>
    %72 = arith.subf %68, %71 : vector<8x8xf32>
    %73 = math.exp %72 : vector<8x8xf32>
    %cst_31 = arith.constant dense<0.000000e+00> : vector<8xf32>
    %74 = vector.multi_reduction <add>, %73, %cst_31 [1] : vector<8x8xf32> to vector<8xf32>
    %75 = vector.shape_cast %74 : vector<8xf32> to vector<8x1xf32>
    %76 = tpu.reciprocal %75 {approx = true} : vector<8x1xf32> -> vector<8x1xf32>
    %77 = vector.broadcast %76 : vector<8x1xf32> to vector<8x8xf32>
    %78 = arith.mulf %73, %77 : vector<8x8xf32>
    %79 = arith.truncf %78 : vector<8x8xf32> to vector<8x8xbf16>
    %cst_32 = arith.constant dense<0.000000e+00> : vector<8x8xf32>
    %80 = tpu.matmul %79, %65, %cst_32 {dimension_numbers = #tpu.dot_dimension_numbers<[1], [0], [0], [1], [0, 0, 1, 1], [], []>} : vector<8x8xbf16>, vector<8x8xbf16>, vector<8x8xf32> -> vector<8x8xf32>
    %81 = arith.truncf %80 : vector<8x8xf32> to vector<8x8xbf16>
    %82 = vector.extract_strided_slice %33 {offsets = [8, 0], sizes = [8, 128], strides = [1, 1]} : vector<32x128xbf16> to vector<8x128xbf16>
    %cst_33 = arith.constant dense<0.000000e+00> : vector<8x128xf32>
    %83 = tpu.matmul %81, %82, %cst_33 {dimension_numbers = #tpu.dot_dimension_numbers<[1], [0], [0], [1], [0, 0, 1, 1], [], []>} : vector<8x8xbf16>, vector<8x128xbf16>, vector<8x128xf32> -> vector<8x128xf32>
    %84 = arith.addf %59, %83 : vector<8x128xf32>
    %85 = vector.extract_strided_slice %28 {offsets = [0, 16], sizes = [8, 8], strides = [1, 1]} : vector<8x32xf32> to vector<8x8xf32>
    %86 = arith.truncf %85 : vector<8x8xf32> to vector<8x8xbf16>
    %87 = vector.extract_strided_slice %30 {offsets = [0, 16], sizes = [8, 8], strides = [1, 1]} : vector<8x32xf32> to vector<8x8xf32>
    %88 = arith.truncf %87 : vector<8x8xf32> to vector<8x8xbf16>
    %89 = vector.extract_strided_slice %32 {offsets = [0, 16], sizes = [8, 8], strides = [1, 1]} : vector<8x32xf32> to vector<8x8xf32>
    %90 = arith.truncf %89 : vector<8x8xf32> to vector<8x8xbf16>
    %cst_34 = arith.constant dense<0.000000e+00> : vector<8x8xf32>
    %91 = tpu.matmul %86, %88, %cst_34 {dimension_numbers = #tpu.dot_dimension_numbers<[1], [1], [0], [0], [0, 0, 1, 0], [], []>} : vector<8x8xbf16>, vector<8x8xbf16>, vector<8x8xf32> -> vector<8x8xf32>
    %cst_35 = arith.constant 0.176776692 : f32
    %92 = vector.broadcast %cst_35 : f32 to vector<8x8xf32>
    %93 = arith.mulf %91, %92 : vector<8x8xf32>
    %cst_36 = arith.constant dense<0xFF800000> : vector<8xf32>
    %94 = vector.multi_reduction <maximumf>, %93, %cst_36 [1] : vector<8x8xf32> to vector<8xf32>
    %95 = vector.shape_cast %94 : vector<8xf32> to vector<8x1xf32>
    %96 = vector.broadcast %95 : vector<8x1xf32> to vector<8x8xf32>
    %97 = arith.subf %93, %96 : vector<8x8xf32>
    %98 = math.exp %97 : vector<8x8xf32>
    %cst_37 = arith.constant dense<0.000000e+00> : vector<8xf32>
    %99 = vector.multi_reduction <add>, %98, %cst_37 [1] : vector<8x8xf32> to vector<8xf32>
    %100 = vector.shape_cast %99 : vector<8xf32> to vector<8x1xf32>
    %101 = tpu.reciprocal %100 {approx = true} : vector<8x1xf32> -> vector<8x1xf32>
    %102 = vector.broadcast %101 : vector<8x1xf32> to vector<8x8xf32>
    %103 = arith.mulf %98, %102 : vector<8x8xf32>
    %104 = arith.truncf %103 : vector<8x8xf32> to vector<8x8xbf16>
    %cst_38 = arith.constant dense<0.000000e+00> : vector<8x8xf32>
    %105 = tpu.matmul %104, %90, %cst_38 {dimension_numbers = #tpu.dot_dimension_numbers<[1], [0], [0], [1], [0, 0, 1, 1], [], []>} : vector<8x8xbf16>, vector<8x8xbf16>, vector<8x8xf32> -> vector<8x8xf32>
    %106 = arith.truncf %105 : vector<8x8xf32> to vector<8x8xbf16>
    %107 = vector.extract_strided_slice %33 {offsets = [16, 0], sizes = [8, 128], strides = [1, 1]} : vector<32x128xbf16> to vector<8x128xbf16>
    %cst_39 = arith.constant dense<0.000000e+00> : vector<8x128xf32>
    %108 = tpu.matmul %106, %107, %cst_39 {dimension_numbers = #tpu.dot_dimension_numbers<[1], [0], [0], [1], [0, 0, 1, 1], [], []>} : vector<8x8xbf16>, vector<8x128xbf16>, vector<8x128xf32> -> vector<8x128xf32>
    %109 = arith.addf %84, %108 : vector<8x128xf32>
    %110 = vector.extract_strided_slice %28 {offsets = [0, 24], sizes = [8, 8], strides = [1, 1]} : vector<8x32xf32> to vector<8x8xf32>
    %111 = arith.truncf %110 : vector<8x8xf32> to vector<8x8xbf16>
    %112 = vector.extract_strided_slice %30 {offsets = [0, 24], sizes = [8, 8], strides = [1, 1]} : vector<8x32xf32> to vector<8x8xf32>
    %113 = arith.truncf %112 : vector<8x8xf32> to vector<8x8xbf16>
    %114 = vector.extract_strided_slice %32 {offsets = [0, 24], sizes = [8, 8], strides = [1, 1]} : vector<8x32xf32> to vector<8x8xf32>
    %115 = arith.truncf %114 : vector<8x8xf32> to vector<8x8xbf16>
    %cst_40 = arith.constant dense<0.000000e+00> : vector<8x8xf32>
    %116 = tpu.matmul %111, %113, %cst_40 {dimension_numbers = #tpu.dot_dimension_numbers<[1], [1], [0], [0], [0, 0, 1, 0], [], []>} : vector<8x8xbf16>, vector<8x8xbf16>, vector<8x8xf32> -> vector<8x8xf32>
    %cst_41 = arith.constant 0.176776692 : f32
    %117 = vector.broadcast %cst_41 : f32 to vector<8x8xf32>
    %118 = arith.mulf %116, %117 : vector<8x8xf32>
    %cst_42 = arith.constant dense<0xFF800000> : vector<8xf32>
    %119 = vector.multi_reduction <maximumf>, %118, %cst_42 [1] : vector<8x8xf32> to vector<8xf32>
    %120 = vector.shape_cast %119 : vector<8xf32> to vector<8x1xf32>
    %121 = vector.broadcast %120 : vector<8x1xf32> to vector<8x8xf32>
    %122 = arith.subf %118, %121 : vector<8x8xf32>
    %123 = math.exp %122 : vector<8x8xf32>
    %cst_43 = arith.constant dense<0.000000e+00> : vector<8xf32>
    %124 = vector.multi_reduction <add>, %123, %cst_43 [1] : vector<8x8xf32> to vector<8xf32>
    %125 = vector.shape_cast %124 : vector<8xf32> to vector<8x1xf32>
    %126 = tpu.reciprocal %125 {approx = true} : vector<8x1xf32> -> vector<8x1xf32>
    %127 = vector.broadcast %126 : vector<8x1xf32> to vector<8x8xf32>
    %128 = arith.mulf %123, %127 : vector<8x8xf32>
    %129 = arith.truncf %128 : vector<8x8xf32> to vector<8x8xbf16>
    %cst_44 = arith.constant dense<0.000000e+00> : vector<8x8xf32>
    %130 = tpu.matmul %129, %115, %cst_44 {dimension_numbers = #tpu.dot_dimension_numbers<[1], [0], [0], [1], [0, 0, 1, 1], [], []>} : vector<8x8xbf16>, vector<8x8xbf16>, vector<8x8xf32> -> vector<8x8xf32>
    %131 = arith.truncf %130 : vector<8x8xf32> to vector<8x8xbf16>
    %132 = vector.extract_strided_slice %33 {offsets = [24, 0], sizes = [8, 128], strides = [1, 1]} : vector<32x128xbf16> to vector<8x128xbf16>
    %cst_45 = arith.constant dense<0.000000e+00> : vector<8x128xf32>
    %133 = tpu.matmul %131, %132, %cst_45 {dimension_numbers = #tpu.dot_dimension_numbers<[1], [0], [0], [1], [0, 0, 1, 1], [], []>} : vector<8x8xbf16>, vector<8x128xbf16>, vector<8x128xf32> -> vector<8x128xf32>
    %134 = arith.addf %109, %133 : vector<8x128xf32>
    %c0_46 = arith.constant 0 : index
    %c0_47 = arith.constant 0 : index
    %135 = vector.load %arg8[%c0_46, %c0_47] : memref<1x128xf32, #tpu.memory_space<vmem>>, vector<1x128xf32>
    %136 = vector.broadcast %135 : vector<1x128xf32> to vector<8x128xf32>
    %137 = arith.addf %134, %136 : vector<8x128xf32>
    %138 = arith.addf %137, %1 : vector<8x128xf32>
    %c0_48 = arith.constant 0 : index
    %c0_49 = arith.constant 0 : index
    %c0_50 = arith.constant 0 : index
    %139 = vector.load %arg9[%c0_48, %c0_49, %c0_50] : memref<1x8x128xf32, #tpu.memory_space<vmem>>, vector<1x8x128xf32>
    %140 = vector.shape_cast %139 : vector<1x8x128xf32> to vector<8x128xf32>
    %141 = vector.shape_cast %138 : vector<8x128xf32> to vector<1x8x128xf32>
    tpu.vector_store %arg9[%c0_48, %c0_49, %c0_50], %141 {strides = array<i32>} : memref<1x8x128xf32, #tpu.memory_space<vmem>>, vector<1x8x128xf32>,
    return
  }
  func.func @transform_0(%arg0: i32) -> (i32, i32, i32) {
    %c0_i32 = arith.constant 0 : i32
    %c0_i32_0 = arith.constant 0 : i32
    %c0_i32_1 = arith.constant 0 : i32
    return %arg0, %c0_i32, %c0_i32_0 : i32, i32, i32
  }
  func.func @transform_1(%arg0: i32) -> (i32, i32) {
    %c0_i32 = arith.constant 0 : i32
    %c0_i32_0 = arith.constant 0 : i32
    %c0_i32_1 = arith.constant 0 : i32
    return %c0_i32, %c0_i32_0 : i32, i32
  }
  func.func @transform_2(%arg0: i32) -> (i32, i32) {
    %c0_i32 = arith.constant 0 : i32
    %c0_i32_0 = arith.constant 0 : i32
    %c0_i32_1 = arith.constant 0 : i32
    return %c0_i32, %c0_i32_0 : i32, i32
  }
  func.func @transform_3(%arg0: i32) -> (i32, i32) {
    %c0_i32 = arith.constant 0 : i32
    %c0_i32_0 = arith.constant 0 : i32
    %c0_i32_1 = arith.constant 0 : i32
    return %c0_i32, %c0_i32_0 : i32, i32
  }
  func.func @transform_4(%arg0: i32) -> (i32, i32) {
    %c0_i32 = arith.constant 0 : i32
    %c0_i32_0 = arith.constant 0 : i32
    %c0_i32_1 = arith.constant 0 : i32
    return %c0_i32, %c0_i32_0 : i32, i32
  }
  func.func @transform_5(%arg0: i32) -> (i32, i32) {
    %c0_i32 = arith.constant 0 : i32
    %c0_i32_0 = arith.constant 0 : i32
    %c0_i32_1 = arith.constant 0 : i32
    return %c0_i32, %c0_i32_0 : i32, i32
  }
  func.func @transform_6(%arg0: i32) -> (i32, i32) {
    %c0_i32 = arith.constant 0 : i32
    %c0_i32_0 = arith.constant 0 : i32
    %c0_i32_1 = arith.constant 0 : i32
    return %c0_i32, %c0_i32_0 : i32, i32
  }
  func.func @transform_7(%arg0: i32) -> (i32, i32) {
    %c0_i32 = arith.constant 0 : i32
    %c0_i32_0 = arith.constant 0 : i32
    %c0_i32_1 = arith.constant 0 : i32
    return %c0_i32, %c0_i32_0 : i32, i32
  }
  func.func @transform_8(%arg0: i32) -> (i32, i32, i32) {
    %c0_i32 = arith.constant 0 : i32
    %c0_i32_0 = arith.constant 0 : i32
    %c0_i32_1 = arith.constant 0 : i32
    return %arg0, %c0_i32, %c0_i32_0 : i32, i32, i32
  }
}

</mosaic_0001>

<bundles_post_ra>
// kernel: tpu_custom_call.1
= control target key start
LH: loop header
LB: loop body
LE: loop exit
PB: predicated region body
PF: predicated region fallthrough
CT: control target
= control target key end

     0   :  { %13 = vsyncpa [#allocation3], 0  ;;  %s2123_s0 = inlined_call_operand.vmem [shape: f32[2,8,128], index: 0, kind: input, shape index: {}]   ;;  %s2124_s1 = inlined_call_operand.vmem [shape: f32[1,128], index: 1, kind: input, shape index: {}]   ;;  %s2125_s2 = inlined_call_operand.vmem [shape: f32[1,128], index: 2, kind: input, shape index: {}]   ;;  %s2126_s3 = inlined_call_operand.vmem [shape: bf16[128,32], index: 3, kind: input, shape index: {}]   ;;  %s2127_s4 = inlined_call_operand.vmem [shape: bf16[128,32], index: 4, kind: input, shape index: {}]   ;;  %s2128_s5 = inlined_call_operand.vmem [shape: bf16[128,32], index: 5, kind: input, shape index: {}]   ;;  %s2129_s6 = inlined_call_operand.vmem [shape: bf16[32,128], index: 6, kind: input, shape index: {}]   ;;  %s2130_s7 = inlined_call_operand.vmem [shape: f32[1,128], index: 7, kind: input, shape index: {}]   ;;  %s2131_s8 = inlined_call_operand.hbm [shape: f32[2,8,128], index: 8, kind: output, shape index: {}]  }
   0x1   :  { %15 = vsyncpa [#allocation3 + $0x1], 0  ;;  %s1799_s27 = smov 0   ;;  %s1801_s28 = smov 0  }
   0x2   :  { %s1803_s29 = smov 0   ;;  %s1805_s30 = smov 0  }
   0x3 LB: > { %s1820_s9 = sadd.s32 4294967295, %s1746_s30   ;;  %s1368_s10 = sadd.s32 4294967294, %s1746_s30   ;;  %s1746_s30 = sphi %s1805_s30, %s2137_s30   ;;  %s1742_s29 = sphi %s1803_s29, %s2136_s29   ;;  %s1738_s28 = sphi %s1801_s28, %s2135_s28   ;;  %s1734_s27 = sphi %s1799_s27, %s2134_s27  }
   0x4   : > { %s1824_s11 = sadd.s32 1, %s1746_s30   ;;  %s201_s12 = sadd.s32 1, %s1742_s29 }
   0x5   : > { %s198_s13 = ssub.s32 %s1746_s30, %s1824_s11  ;;  %p211_p0 = scmp.ne.s32.totalorder %s1742_s29, %s1738_s28 }
   0x6   : > { %p199_p1 = scmp.eq.s32.totalorder %s198_s13, 0  ;;  %p212_p2 = scmp.eq.s32.totalorder %s1820_s9, 1 }
   0x7   : > { %p217_p3 = scmp.ne.s32.totalorder %s1738_s28, %s1734_s27  ;;  %p218_p4 = scmp.eq.s32.totalorder %s1368_s10, 1 }
   0x8   : > { %s1835_s14 = scalar_select %p199_p1, %s1742_s29, %s201_s12  }
   0x9   : > { %p1837_p5 = por %p212_p2, %p211_p0  ;;  %p1841_p6 = por %p218_p4, %p217_p3 }
   0xa   : > { %p1371_p7 = scmp.ge.s32.totalorder %s1746_s30, 1  ;;  %p264_p8 = scmp.lt.s32.totalorder %s1746_s30, 3 }
   0xc   : > { %p265_p9 = pnand %p1371_p7, %p264_p8 }
   0xd   : > { %p297_p10 = scmp.lt.s32.totalorder (!%p265_p9), %s1820_s9, 1  ;;  %s1750_s22 = smov (!%p265_p9), 120  }
   0xe   : > { %268 = sbr.rel (%p265_p9) target bundleno = 3059 (0xbf3), region = 52  ;;  %s1751_s23 = smov (!%p265_p9), 112  }
   0xf   : > { %s1752_s12 = smov (!%p265_p9), 104   ;;  %s294_s20 = sand.u32 (!%p265_p9), 1, %s1738_s28  }
  0x10   : > { %s1414_s24 = sshll.u32 (!%p265_p9), %s1820_s9, 7 }
  0x11   : > { %s2088_s13 = scalar_lea.hbm (!%p265_p9), %s2131_s8, %s1414_s24 }
  0x13   : > { %v1748_v0 = vmov 0.0   ;;  %s298_s17 = scalar_select %p297_p10, %s1820_s9, 1  ;;  %v1644_v3 = vld [vmem:[%s2126_s3 + $0x38] sm:$0xff]   ;;  %v1646_v5 = vld [vmem:[%s2126_s3 + $0x30] sm:$0xff]   ;;  %v1648_v7 = vld [vmem:[%s2126_s3 + $0x28] sm:$0xff]   ;;  %vm1749_vm0 = vmmov 0  }
  0x14   : > { %1468 = vmatprep.subr.bf16.mxu0 %v1748_v0  ;;  %1488 = vmatprep.subr.bf16.mxu1 %v1748_v0  ;;  %v1645_v4 = vld [vmem:[%s2127_s4 + $0x38] sm:$0xff]   ;;  %v1647_v6 = vld [vmem:[%s2127_s4 + $0x30] sm:$0xff]   ;;  %v1649_v8 = vld [vmem:[%s2127_s4 + $0x28] sm:$0xff]   ;;  %vm652_vm1 = vcmask 64512   ;;  %vm715_vm2 = vcmask 1043456   ;;  %s1753_s9 = smov [#allocation2]  }
  0x15   : > { %s1373_s18 = sshll.u32 %s298_s17, 3  ;;  %1469 = vmatpush3.bf16.msra.mxu0 %v1644_v3  ;;  %1489 = vmatpush3.bf16.msra.mxu1 %v1645_v4  ;;  %v1650_v9 = vld [vmem:[%s2126_s3 + $0x20] sm:$0xff]   ;;  %v1652_v11 = vld [vmem:[%s2126_s3 + $0x18] sm:$0xff]   ;;  %v1654_v13 = vld [vmem:[%s2126_s3 + $0x10] sm:$0xff]   ;;  %s1296_s17 = scalar_lea.sflag [#allocation3], %s294_s20 }
  0x16   : > { %s300_s21 = scalar_lea.vmem %s2123_s0, %s1373_s18  ;;  %1470 = vmatprep.subr.bf16.mxu0 %v1748_v0  ;;  %1490 = vmatprep.subr.bf16.mxu1 %v1748_v0  ;;  %v1651_v10 = vld [vmem:[%s2127_s4 + $0x20] sm:$0xff]   ;;  %v1653_v12 = vld [vmem:[%s2127_s4 + $0x18] sm:$0xff]   ;;  %v1655_v14 = vld [vmem:[%s2127_s4 + $0x10] sm:$0xff]   ;;  %s1690_s19 = sshll.u32 %s1753_s9, 4  ;;  %s1691_s19 = int_to_ptr.vmem [resolvable:$false] %s1690_s19 }
  0x17   : > { %v1854_v1 = vld [vmem:[%s300_s21] sm:$0xff]  ;;  %1484 = vmatprep.mubr.msk.bf16.mxu0 %vm1749_vm0, %v1748_v0  ;;  %1504 = vmatprep.mubr.msk.bf16.mxu1 %vm1749_vm0, %v1748_v0  ;;  %v1656_v15 = vld [vmem:[%s2126_s3 + $0x8] sm:$0xff]   ;;  %v1660_v33 = vld [vmem:[%s2128_s5 + $0x38] sm:$0xff]   ;;  %s1372_s21 = sshll.u32 %s294_s20, 3 }
  0x18   : > { %303 = vadd.xlane.f32.xlu0 %v1854_v1  ;;  %v306_v2 = vmul.f32 %v1854_v1, %v1854_v1  ;;  %v1657_v16 = vld [vmem:[%s2127_s4 + $0x8] sm:$0xff]   ;;  %v1658_v17 = vld [vmem:[%s2126_s3] sm:$0xff]   ;;  %v1661_v35 = vld [vmem:[%s2128_s5 + $0x30] sm:$0xff]   ;;  %s296_s25 = scalar_lea.vmem [#allocation2], %s1372_s21  ;;  %s1692_s21 = scalar_lea.vmem %s1691_s19, 256 }
  0x19   : > { %1471 = vmatpush3.bf16.msra.mxu0 %v1646_v5  ;;  %1491 = vmatpush3.bf16.msra.mxu1 %v1647_v6  ;;  %v1659_v18 = vld [vmem:[%s2127_s4] sm:$0xff]   ;;  %v1662_v36 = vld [vmem:[%s2128_s5 + $0x28] sm:$0xff]   ;;  %v1664_v38 = vld [vmem:[%s2128_s5 + $0x18] sm:$0xff]   ;;  %s1309_s26 = sshll.u32 %s296_s25, 4  ;;  %s1310_s26 = int_to_ptr.vmem [resolvable:$true] %s1309_s26 }
  0x1a   : > { %1472 = vmatprep.subr.bf16.mxu0 %v1748_v0  ;;  %1492 = vmatprep.subr.bf16.mxu1 %v1748_v0  ;;  %v1374_v28 = vld [vmem:[%s2124_s1] ss:$0 sm:$0xff]  ;;  %v1665_v39 = vld [vmem:[%s2128_s5 + $0x10] sm:$0xff]   ;;  %v1666_v40 = vld [vmem:[%s2128_s5 + $0x8] sm:$0xff]   ;;  %s1686_s18 = scalar_lea.vmem %s1310_s26, 128  ;;  %p1693_p0 = scmp.lt.s32.totalorder %s1310_s26, %s1691_s19 }
  0x1b   : > { %v1375_v30 = vld [vmem:[%s2125_s2] ss:$0 sm:$0xff]  ;;  %p1687_p11 = scmp.ne.s32.totalorder %s1310_s26, %s1686_s18  ;;  %p1694_p1 = scmp.lt.s32.totalorder %s1692_s21, %s1686_s18 }
  0x1c   : > { %307 = vadd.xlane.f32.xlu0 %v306_v2  ;;  %v1663_v37 = vld [vmem:[%s2128_s5 + $0x20] sm:$0xff]  }
  0x1d   : > { %1473 = vmatpush3.bf16.msra.mxu0 %v1648_v7  ;;  %1493 = vmatpush3.bf16.msra.mxu1 %v1649_v8  ;;  %v1667_v41 = vld [vmem:[%s2128_s5] sm:$0xff]   ;;  %p1688_p12 = pnand %p1687_p11, %p1837_p5  ;;  %p1695_p2 = por %p1694_p1, %p1693_p0 }
  0x1e   : > { %1474 = vmatprep.subr.bf16.mxu0 %v1748_v0  ;;  %1494 = vmatprep.subr.bf16.mxu1 %v1748_v0 }
  0x1f   : > { %p1689_p13 = pneg %p1688_p12 }
  0x21   : > { %1475 = vmatpush3.bf16.msra.mxu0 %v1650_v9  ;;  %1495 = vmatpush3.bf16.msra.mxu1 %v1651_v10  ;;  %p1696_p3 = pnand %p1695_p2, %p1689_p13 }
  0x22   : > { %1476 = vmatprep.subr.bf16.mxu0 %v1748_v0  ;;  %1496 = vmatprep.subr.bf16.mxu1 %v1748_v0 }
  0x25   : > { %1477 = vmatpush3.bf16.msra.mxu0 %v1652_v11  ;;  %1497 = vmatpush3.bf16.msra.mxu1 %v1653_v12 }
  0x26   : > { %1478 = vmatprep.subr.bf16.mxu0 %v1748_v0  ;;  %1498 = vmatprep.subr.bf16.mxu1 %v1748_v0 }
  0x29   : > { %1479 = vmatpush3.bf16.msra.mxu0 %v1654_v13  ;;  %1499 = vmatpush3.bf16.msra.mxu1 %v1655_v14 }
  0x2a   : > { %1480 = vmatprep.subr.bf16.mxu0 %v1748_v0  ;;  %1500 = vmatprep.subr.bf16.mxu1 %v1748_v0 }
  0x2d   : > { %1481 = vmatpush3.bf16.msra.mxu0 %v1656_v15  ;;  %1501 = vmatpush3.bf16.msra.mxu1 %v1657_v16 }
  0x2e   : > { %1482 = vmatprep.subr.bf16.mxu0 %v1748_v0  ;;  %1502 = vmatprep.subr.bf16.mxu1 %v1748_v0 }
  0x31   : > { %1483 = vmatpush3.bf16.msra.mxu0 %v1658_v17  ;;  %1503 = vmatpush3.bf16.msra.mxu1 %v1659_v18 }
  0x32   : > { %1508 = vmatprep.subr.bf16.mxu0 %v1748_v0  ;;  %1528 = vmatprep.subr.bf16.mxu1 %v1748_v0 }
  0xa1   : > { %v304_v19 = vpop.xlane.xlu0 %303 }
  0xa2   : > { %v305_v20 = vmul.f32 0.03125, %v304_v19 }
  0xa4   : > { %v311_v22 = vmul.f32 %v305_v20, %v305_v20  ;;  %v310_v26 = vsub.f32 %v1854_v1, %v305_v20 }
  0xa5   : > { %v308_v21 = vpop.xlane.xlu0 %307 }
  0xa6   : > { %v309_v23 = vmul.f32 0.03125, %v308_v21 }
  0xa8   : > { %v312_v24 = vsub.f32 %v309_v23, %v311_v22 }
  0xaa   : > { %v313_v25 = vadd.f32 1e-05, %v312_v24 }
  0xac   : > { %1668 = vrsqrt.f32 %v313_v25 }
  0xb9   : > { %v1669_v27 = vpop.eup %1668 }
  0xba   : > { %v315_v29 = vmul.f32 %v1669_v27, %v310_v26 }
  0xbc   : > { %v323_v31 = vmul.f32 %v1374_v28, %v315_v29 }
  0xbe   : > { %v331_v32 = vadd.f32 %v1375_v30, %v323_v31  ;;  %v646_v30 = vld [vmem:[%s2129_s6 + $0x4] sm:$0xf] }
  0xbf   : > { %v879_v31 = vsel %vm715_vm2, %v646_v30, 0 }
  0xc0   : > { %v332_v34 = vpack.c.bf16 %v331_v32, %v331_v32 }
  0xc2   : > { %1485 = vmatmul.mubr.bf16.vlgmr.msra.gmra.mxu0 %v332_v34  ;;  %1505 = vmatmul.mubr.bf16.vlgmr.msra.gmra.mxu1 %v332_v34 }
  0xc3   : > { %1509 = vmatpush3.bf16.msra.mxu0 %v1660_v33  ;;  %1524 = vmatprep.mubr.msk.bf16.mxu0 %vm1749_vm0, %v1748_v0 }
  0xc4   : > { %1510 = vmatprep.subr.bf16.mxu0 %v1748_v0  ;;  %1530 = vmatprep.mubr.msk.bf16.mxu1 %vm1749_vm0, %v1748_v0 }
  0xc7   : > { %1511 = vmatpush3.bf16.msra.mxu0 %v1661_v35 }
  0xc8   : > { %1512 = vmatprep.subr.bf16.mxu0 %v1748_v0 }
  0xcb   : > { %1513 = vmatpush3.bf16.msra.mxu0 %v1662_v36  ;;  %v645_v36 = vld [vmem:[%s2129_s6] sm:$0xf] }
  0xcc   : > { %1514 = vmatprep.subr.bf16.mxu0 %v1748_v0 }
  0xcf   : > { %1515 = vmatpush3.bf16.msra.mxu0 %v1663_v37 }
  0xd0   : > { %1516 = vmatprep.subr.bf16.mxu0 %v1748_v0 }
  0xd3   : > { %1517 = vmatpush3.bf16.msra.mxu0 %v1664_v38 }
  0xd4   : > { %1518 = vmatprep.subr.bf16.mxu0 %v1748_v0 }
  0xd7   : > { %1519 = vmatpush3.bf16.msra.mxu0 %v1665_v39  ;;  %v925_v39 = vsel %vm715_vm2, %v645_v36, 0 }
  0xd8   : > { %1520 = vmatprep.subr.bf16.mxu0 %v1748_v0 }
  0xdb   : > { %1521 = vmatpush3.bf16.msra.mxu0 %v1666_v40 }
  0xdc   : > { %1522 = vmatprep.subr.bf16.mxu0 %v1748_v0 }
  0xdf   : > { %1523 = vmatpush3.bf16.msra.mxu0 %v1667_v41 }
  0xe0   : > { %1552 = vmatprep.subr.bf16.mxu0 %v1748_v0 }
  0xe2   : > { %1525 = vmatmul.mubr.bf16.vlgmr.msra.gmra.mxu0 %v332_v34 }
  0xe3   : > { %1554 = vmatprep.mubr.msk.bf16.mxu0 %vm1749_vm0, %v1748_v0  ;;  %1553 = vmatpush3.bf16.msra.mxu0 %v879_v31 }
  0xe4   : > { %1564 = vmatprep.subr.bf16.mxu0 %v1748_v0 }
 0x182   : > { %v431_v42 = vpop.f32.mrf.mxu0  ;;  %v535_v43 = vpop.f32.mrf.mxu1 }
 0x183   : > { %v1972_v44 = vpack.c.bf16 %v535_v43, %v535_v43  ;;  %v1979_v52 = vpack.c.bf16 %v431_v42, %v431_v42 }
 0x184   : > { %v1486_v45 = vpop.f32.mrf.mxu0  ;;  %v1506_v46 = vpop.f32.mrf.mxu1 }
 0x185   : > { %764 = vrot.lane.b32.xlu0 %v1972_v44, %s1750_s22  ;;  %v657_v47 = vsel %vm652_vm1, %v1972_v44, 0 }
 0x186   : > { %v434_v48 = vpop.f32.mrf.mxu0  ;;  %v538_v49 = vpop.f32.mrf.mxu1  ;;  %1529 = vmatpush3.bf16.xpose.msra.mxu1 %v657_v47 }
 0x187   : > { %1534 = vmatprep.subr.bf16.mxu1 %v1748_v0 }
 0x188   : > { %v1487_v50 = vpop.f32.mrf.mxu0  ;;  %v1507_v51 = vpop.f32.mrf.mxu1 }
 0x18d   : > { %1531 = vmatmul.mubr.msk.bf16.vlgmr.msra.gmra.mxu1 %vm652_vm1, %v1979_v52 }
 0x18e   : > { %1536 = vmatprep.mubr.msk.bf16.mxu1 %vm1749_vm0, %v1748_v0 }
 0x1a2   : > { %v639_v53 = vpop.f32.mrf.mxu0 }
 0x1a3   : > { %v1985_v54 = vpack.c.bf16 %v639_v53, %v639_v53 }
 0x1a4   : > { %v1526_v55 = vpop.f32.mrf.mxu0 }
 0x1a5   : > { %v717_v56 = vsel %vm715_vm2, %v1985_v54, 0 }
 0x1a6   : > { %v642_v57 = vpop.f32.mrf.mxu0  ;;  %1535 = vmatpush3.bf16.msra.mxu1 %v717_v56 }
 0x1a7   : > { %1540 = vmatprep.subr.bf16.mxu1 %v1748_v0 }
 0x1a8   : > { %v1527_v58 = vpop.f32.mrf.mxu0 }
 0x1f7   : > { %v765_v11 = vpop.permute.xlu0 %764 }
 0x1f8   : > { %v770_v13 = vsel %vm652_vm1, %v765_v11, 0 }
 0x24d   : > { %v693_v59 = vpop.f32.mrf.mxu1 }
 0x24e   : > { %v699_v60 = vmul.f32 0.17677669, %v693_v59 }
 0x24f   : > { %v1532_v61 = vpop.f32.mrf.mxu1 }
 0x250   : > { %v700_v62 = vsel %vm652_vm1, %v699_v60, -inf }
 0x251   : > { %701 = vmax.xlane.f32.xlu1 %v700_v62  ;;  %v696_v63 = vpop.f32.mrf.mxu1 }
 0x253   : > { %v1533_v2 = vpop.f32.mrf.mxu1 }
 0x2da   : > { %v702_v3 = vpop.xlane.xlu1 %701 }
 0x2db   : > { %v703_v4 = vsub.f32 %v699_v60, %v702_v3 }
 0x2dd   : > { %v704_v5 = vmul.f32 1.442695, %v703_v4 }
 0x2df   : > { %1670 = vpow2.f32 %v704_v5 }
 0x2ec   : > { %v1671_v6 = vpop.eup %1670 }
 0x2ed   : > { %v706_v7 = vsel %vm652_vm1, %v1671_v6, 0.0 }
 0x2ee   : > { %707 = vadd.xlane.f32.xlu1 %v706_v7 }
 0x2ff   : > { %761 = vrot.lane.b32.xlu1 %v1979_v52, %s1750_s22 }
 0x377   : > { %v708_v8 = vpop.xlane.xlu1 %707 }
 0x378   : > { %1672 = vrcp.f32 %v708_v8 }
 0x37b   : > { %v762_v14 = vpop.permute.xlu1 %761 }
 0x385   : > { %v1673_v9 = vpop.eup %1672 }
 0x386   : > { %v710_v10 = vmul.f32 %v1673_v9, %v1671_v6 }
 0x388   : > { %v711_v12 = vpack.c.bf16 %v710_v10, %v710_v10 }
 0x38a   : > { %1537 = vmatmul.mubr.msk.bf16.vlgmr.msra.gmra.mxu1 %vm652_vm1, %v711_v12 }
 0x38b   : > { %1541 = vmatpush3.bf16.xpose.msra.mxu1 %v770_v13  ;;  %1542 = vmatprep.mubr.msk.bf16.mxu1 %vm1749_vm0, %v1748_v0 }
 0x38c   : > { %1546 = vmatprep.subr.bf16.mxu1 %v1748_v0 }
 0x392   : > { %1543 = vmatmul.mubr.msk.bf16.vlgmr.msra.gmra.mxu1 %vm652_vm1, %v762_v14 }
 0x393   : > { %1548 = vmatprep.mubr.msk.bf16.mxu1 %vm1749_vm0, %v1748_v0 }
 0x44a   : > { %v753_v15 = vpop.f32.mrf.mxu1 }
 0x44b   : > { %v759_v40 = vpack.c.bf16 %v753_v15, %v753_v15 }
 0x44c   : > { %v1538_v16 = vpop.f32.mrf.mxu1 }
 0x44d   : > { %v647_v16 = vld [vmem:[%s2129_s6 + $0x8] sm:$0xf] }
 0x44e   : > { %v756_v17 = vpop.f32.mrf.mxu1 }
 0x44f   : > { %v1083_v17 = vsel %vm715_vm2, %v647_v16, 0 }
 0x450   : > { %v1539_v18 = vpop.f32.mrf.mxu1 }
 0x452   : > { %v806_v19 = vpop.f32.mrf.mxu1 }
 0x453   : > { %v812_v20 = vmul.f32 0.17677669, %v806_v19 }
 0x454   : > { %v1544_v21 = vpop.f32.mrf.mxu1 }
 0x455   : > { %v813_v22 = vsel %vm652_vm1, %v812_v20, -inf }
 0x456   : > { %814 = vmax.xlane.f32.xlu1 %v813_v22  ;;  %v809_v23 = vpop.f32.mrf.mxu1 }
 0x458   : > { %v1545_v24 = vpop.f32.mrf.mxu1 }
 0x467   : > { %969 = vrot.lane.b32.xlu1 %v1972_v44, %s1751_s23 }
 0x46b   : > { %967 = vrot.lane.b32.xlu1 %v1979_v52, %s1751_s23 }
 0x4df   : > { %v815_v25 = vpop.xlane.xlu1 %814 }
 0x4e0   : > { %v816_v26 = vsub.f32 %v812_v20, %v815_v25 }
 0x4e2   : > { %v817_v27 = vmul.f32 1.442695, %v816_v26 }
 0x4e3   : > { %v970_v41 = vpop.permute.xlu1 %969 }
 0x4e4   : > { %1674 = vpow2.f32 %v817_v27  ;;  %v975_v46 = vsel %vm652_vm1, %v970_v41, 0 }
 0x4e7   : > { %v968_v50 = vpop.permute.xlu1 %967 }
 0x4f1   : > { %v1675_v28 = vpop.eup %1674 }
 0x4f2   : > { %v819_v29 = vsel %vm652_vm1, %v1675_v28, 0.0 }
 0x4f3   : > { %820 = vadd.xlane.f32.xlu0 %v819_v29 }
 0x509   : > { %826 = vrot.lane.b32.xlu0 %v1985_v54, %s1750_s22 }
 0x57c   : > { %v821_v32 = vpop.xlane.xlu0 %820 }
 0x57d   : > { %1676 = vrcp.f32 %v821_v32 }
 0x580   : > { %v827_v33 = vpop.permute.xlu0 %826 }
 0x581   : > { %v832_v34 = vsel %vm715_vm2, %v827_v33, 0 }
 0x582   : > { %1547 = vmatpush3.bf16.msra.mxu1 %v832_v34 }
 0x583   : > { %1558 = vmatprep.subr.bf16.mxu1 %v1748_v0 }
 0x58a   : > { %v1677_v35 = vpop.eup %1676 }
 0x58b   : > { %v823_v37 = vmul.f32 %v1677_v35, %v1675_v28 }
 0x58d   : > { %v824_v38 = vpack.c.bf16 %v823_v37, %v823_v37 }
 0x58f   : > { %1549 = vmatmul.mubr.msk.bf16.vlgmr.msra.gmra.mxu1 %vm652_vm1, %v824_v38 }
 0x590   : > { %1559 = vmatpush3.bf16.msra.mxu1 %v925_v39  ;;  %1560 = vmatprep.mubr.msk.bf16.mxu1 %vm1749_vm0, %v1748_v0 }
 0x591   : > { %1570 = vmatprep.subr.bf16.mxu1 %v1748_v0 }
 0x597   : > { %1561 = vmatmul.mubr.msk.bf16.vlgmr.msra.gmra.mxu1 %vm652_vm1, %v759_v40 }
 0x598   : > { %1572 = vmatprep.mubr.msk.bf16.mxu1 %vm1749_vm0, %v1748_v0 }
 0x64f   : > { %v868_v42 = vpop.f32.mrf.mxu1 }
 0x650   : > { %v874_v43 = vpack.c.bf16 %v868_v42, %v868_v42 }
 0x651   : > { %v1550_v45 = vpop.f32.mrf.mxu1 }
 0x652   : > { %1555 = vmatmul.mubr.msk.bf16.vlgmr.msra.gmra.mxu0 %vm652_vm1, %v874_v43 }
 0x653   : > { %1565 = vmatpush3.bf16.xpose.msra.mxu0 %v975_v46  ;;  %v871_v47 = vpop.f32.mrf.mxu1  ;;  %1566 = vmatprep.mubr.msk.bf16.mxu0 %vm1749_vm0, %v1748_v0 }
 0x654   : > { %1576 = vmatprep.subr.bf16.mxu0 %v1748_v0 }
 0x655   : > { %v1551_v48 = vpop.f32.mrf.mxu1 }
 0x657   : > { %v2033_v49 = vpop.f32.mrf.mxu1 }
 0x659   : > { %v1562_v51 = vpop.f32.mrf.mxu1 }
 0x65a   : > { %1567 = vmatmul.mubr.msk.bf16.vlgmr.msra.gmra.mxu0 %vm652_vm1, %v968_v50 }
 0x65b   : > { %v964_v53 = vpop.f32.mrf.mxu1  ;;  %1578 = vmatprep.mubr.msk.bf16.mxu0 %vm1749_vm0, %v1748_v0  ;;  %1577 = vmatpush3.bf16.msra.mxu0 %v1083_v17 }
 0x65c   : > { %1588 = vmatprep.subr.bf16.mxu0 %v1748_v0 }
 0x65d   : > { %v1563_v55 = vpop.f32.mrf.mxu1 }
 0x65e   : > { %v1412_v55 = vld [vmem:[%s2130_s7] ss:$0 sm:$0xff] }
 0x712   : > { %v2038_v56 = vpop.f32.mrf.mxu0 }
 0x713   : > { %v962_v35 = vadd.f32 %v2033_v49, %v2038_v56 }
 0x714   : > { %v1556_v57 = vpop.f32.mrf.mxu0 }
 0x716   : > { %v918_v58 = vpop.f32.mrf.mxu0 }
 0x718   : > { %v1557_v59 = vpop.f32.mrf.mxu0 }
 0x71a   : > { %v1011_v60 = vpop.f32.mrf.mxu0 }
 0x71b   : > { %v1017_v61 = vmul.f32 0.17677669, %v1011_v60 }
 0x71c   : > { %v1568_v62 = vpop.f32.mrf.mxu0 }
 0x71d   : > { %v1018_v63 = vsel %vm652_vm1, %v1017_v61, -inf }
 0x71e   : > { %1019 = vmax.xlane.f32.xlu1 %v1018_v63  ;;  %v1014_v2 = vpop.f32.mrf.mxu0 }
 0x720   : > { %v1569_v3 = vpop.f32.mrf.mxu0 }
 0x72f   : > { %1128 = vrot.lane.b32.xlu1 %v1972_v44, %s1752_s12 }
 0x733   : > { %1126 = vrot.lane.b32.xlu1 %v1979_v52, %s1752_s12 }
 0x7a7   : > { %v1020_v4 = vpop.xlane.xlu1 %1019 }
 0x7a8   : > { %v1021_v5 = vsub.f32 %v1017_v61, %v1020_v4 }
 0x7aa   : > { %v1022_v6 = vmul.f32 1.442695, %v1021_v5 }
 0x7ab   : > { %v1129_v12 = vpop.permute.xlu1 %1128 }
 0x7ac   : > { %1678 = vpow2.f32 %v1022_v6  ;;  %v1134_v14 = vsel %vm652_vm1, %v1129_v12, 0 }
 0x7af   : > { %v1127_v15 = vpop.permute.xlu1 %1126 }
 0x7b9   : > { %v1679_v7 = vpop.eup %1678 }
 0x7ba   : > { %v1024_v8 = vsel %vm652_vm1, %v1679_v7, 0.0 }
 0x7bb   : > { %1025 = vadd.xlane.f32.xlu0 %v1024_v8 }
 0x7d1   : > { %1030 = vrot.lane.b32.xlu0 %v1985_v54, %s1751_s23 }
 0x844   : > { %v1026_v9 = vpop.xlane.xlu0 %1025 }
 0x845   : > { %1680 = vrcp.f32 %v1026_v9 }
 0x848   : > { %v1031_v10 = vpop.permute.xlu0 %1030 }
 0x849   : > { %v1036_v11 = vsel %vm715_vm2, %v1031_v10, 0 }
 0x84a   : > { %1571 = vmatpush3.bf16.msra.mxu1 %v1036_v11 }
 0x84b   : > { %1582 = vmatprep.subr.bf16.mxu1 %v1748_v0 }
 0x852   : > { %v1681_v44 = vpop.eup %1680 }
 0x853   : > { %v1028_v52 = vmul.f32 %v1681_v44, %v1679_v7 }
 0x855   : > { %v1029_v13 = vpack.c.bf16 %v1028_v52, %v1028_v52 }
 0x857   : > { %1573 = vmatmul.mubr.msk.bf16.vlgmr.msra.gmra.mxu1 %vm652_vm1, %v1029_v13 }
 0x858   : > { %1583 = vmatpush3.bf16.xpose.msra.mxu1 %v1134_v14  ;;  %1584 = vmatprep.mubr.msk.bf16.mxu1 %vm1749_vm0, %v1748_v0 }
 0x859   : > { %1594 = vmatprep.subr.bf16.mxu1 %v1748_v0 }
 0x85f   : > { %1585 = vmatmul.mubr.msk.bf16.vlgmr.msra.gmra.mxu1 %vm652_vm1, %v1127_v15 }
 0x860   : > { %1596 = vmatprep.mubr.msk.bf16.mxu1 %vm1749_vm0, %v1748_v0 }
 0x917   : > { %v1072_v18 = vpop.f32.mrf.mxu1 }
 0x918   : > { %v1078_v19 = vpack.c.bf16 %v1072_v18, %v1072_v18 }
 0x919   : > { %v1574_v20 = vpop.f32.mrf.mxu1 }
 0x91a   : > { %1579 = vmatmul.mubr.msk.bf16.vlgmr.msra.gmra.mxu0 %vm652_vm1, %v1078_v19 }
 0x91b   : > { %v1075_v21 = vpop.f32.mrf.mxu1  ;;  %1590 = vmatprep.mubr.msk.bf16.mxu0 %vm1749_vm0, %v1748_v0 }
 0x91d   : > { %v1575_v22 = vpop.f32.mrf.mxu1 }
 0x91f   : > { %v1170_v23 = vpop.f32.mrf.mxu1 }
 0x920   : > { %v1176_v24 = vmul.f32 0.17677669, %v1170_v23 }
 0x921   : > { %v1586_v25 = vpop.f32.mrf.mxu1 }
 0x922   : > { %v1177_v26 = vsel %vm652_vm1, %v1176_v24, -inf }
 0x923   : > { %1178 = vmax.xlane.f32.xlu0 %v1177_v26  ;;  %v1173_v27 = vpop.f32.mrf.mxu1 }
 0x925   : > { %v1587_v28 = vpop.f32.mrf.mxu1 }
 0x939   : > { %1189 = vrot.lane.b32.xlu0 %v1985_v54, %s1752_s12  ;;  %v648_v54 = vld [vmem:[%s2129_s6 + $0xc] sm:$0xf] }
 0x93a   : > { %v1242_v39 = vsel %vm715_vm2, %v648_v54, 0 }
 0x93b   : > { %1595 = vmatpush3.bf16.msra.mxu1 %v1242_v39 }
 0x9ac   : > { %v1179_v29 = vpop.xlane.xlu0 %1178 }
 0x9ad   : > { %v1180_v30 = vsub.f32 %v1176_v24, %v1179_v29 }
 0x9af   : > { %v1181_v31 = vmul.f32 1.442695, %v1180_v30 }
 0x9b0   : > { %v1190_v32 = vpop.permute.xlu0 %1189 }
 0x9b1   : > { %1682 = vpow2.f32 %v1181_v31  ;;  %v1195_v33 = vsel %vm715_vm2, %v1190_v32, 0 }
 0x9b2   : > { %1589 = vmatpush3.bf16.msra.mxu0 %v1195_v33 }
 0x9be   : > { %v1683_v0 = vpop.eup %1682 }
 0x9bf   : > { %v1183_v34 = vsel %vm652_vm1, %v1683_v0, 0.0 }
 0x9c0   : > { %1184 = vadd.xlane.f32.xlu1 %v1183_v34 }
 0x9da   : > { %v1119_v36 = vpop.f32.mrf.mxu0 }
 0x9db   : > { %v1125_v37 = vadd.f32 %v1119_v36, %v962_v35 }
 0x9dc   : > { %v1580_v38 = vpop.f32.mrf.mxu0 }
 0x9de   : > { %v1122_v40 = vpop.f32.mrf.mxu0 }
 0x9e0   : > { %v1581_v41 = vpop.f32.mrf.mxu0 }
 0xa49   : > { %v1185_v42 = vpop.xlane.xlu1 %1184 }
 0xa4a   : > { %1684 = vrcp.f32 %v1185_v42 }
 0xa57   : > { %v1685_v43 = vpop.eup %1684 }
 0xa58   : > { %v1187_v45 = vmul.f32 %v1685_v43, %v1683_v0 }
 0xa5a   : > { %v1188_v46 = vpack.c.bf16 %v1187_v45, %v1187_v45 }
 0xa5c   : > { %1591 = vmatmul.mubr.msk.bf16.vlgmr.msra.gmra.mxu0 %vm652_vm1, %v1188_v46 }
 0xb1c   : > { %v1231_v47 = vpop.f32.mrf.mxu0 }
 0xb1d   : > { %v1237_v48 = vpack.c.bf16 %v1231_v47, %v1231_v47 }
 0xb1e   : > { %v1592_v49 = vpop.f32.mrf.mxu0 }
 0xb1f   : > { %1597 = vmatmul.mubr.msk.bf16.vlgmr.msra.gmra.mxu1 %vm652_vm1, %v1237_v48 }
 0xb20   : > { %v1234_v50 = vpop.f32.mrf.mxu0 }
 0xb22   : > { %v1593_v51 = vpop.f32.mrf.mxu0 }
 0xbdf   : > { %v1278_v53 = vpop.f32.mrf.mxu1 }
 0xbe0   : > { %v1284_v56 = vadd.f32 %v1278_v53, %v1125_v37 }
 0xbe1   : > { %v1598_v57 = vpop.f32.mrf.mxu1 }
 0xbe2   : > { %v1292_v58 = vadd.f32 %v1412_v55, %v1284_v56 }
 0xbe3   : > { %v1281_v59 = vpop.f32.mrf.mxu1 }
 0xbe4   : > { %v1293_v60 = vadd.f32 %v1292_v58, %v1854_v1 }
 0xbe5   : > { %v1599_v61 = vpop.f32.mrf.mxu1 }
 0xbe6   : > { %1294 = vst [vmem:[%s296_s25] sm:$0xff] %v1293_v60 }
 0xbe7   : > { %1699 = shalt.err (!%p1696_p3)
}
 0xbe8   : > { %s1700_s22 = scalar_lea.hbm %s2088_s13, 128  ;;  %s1704_s24 = scalar_lea.hbm %s2131_s8, 256 }
 0xbe9   : > { %p1701_p4 = scmp.ne.s32.totalorder %s2088_s13, %s1700_s22  ;;  %p1705_p9 = scmp.lt.s32.totalorder %s2088_s13, %s2131_s8 }
 0xbea   : > { %p1706_p10 = scmp.lt.s32.totalorder %s1704_s24, %s1700_s22 }
 0xbeb   : > { %p1702_p7 = pnand %p1701_p4, %p1837_p5 }
 0xbec   : > { %p1707_p11 = por %p1706_p10, %p1705_p9 }
 0xbed   : > { %p1703_p8 = pneg %p1702_p7 }
 0xbef   : > { %p1708_p12 = pnand %p1707_p11, %p1703_p8 }
 0xbf1   : > { %1711 = shalt.err (!%p1708_p12)
}
 0xbf2   : > { %1600 = dma.vmem_to_hbm [thread:$0]  (%p1837_p5), %s1310_s26, 128, %s2088_s13, %s1296_s17  }
 0xbf3 PF: > { %p1606_p13 = scmp.ge.s32.totalorder %s1746_s30, 2  ;;  %s1321_s12 = sand.u32 1, %s1734_s27  }
 0xbf4   : > { %s1322_s18 = scalar_lea.sflag [#allocation3], %s1321_s12 }
 0xbf5   : > { %p1603_p0 = pnand %p1606_p13, %p1841_p6 }
 0xbf7   : > { %p1604_p1 = pneg %p1603_p0 }
 0xbf9   : > { %1729 = dma.done.wait (%p1604_p1), %s1322_s18, 128  }
 0xbfa   : > { %1731 = vsyncadd (%p1604_p1), %s1322_s18, 4294967168  ;;  %p18_p2 = scmp.ge.s32.totalorder %s1824_s11, 4   ;;  %s2134_s27 = smov %s1738_s28 }
 0xbfb   : > { %s2135_s28 = smov %s1742_s29  ;;  %s2136_s29 = smov %s1835_s14 }
 0xbfc   : > { %s2137_s30 = smov %s1824_s11  ;;  %20 = sbr.rel (!%p18_p2) target bundleno = 3 (0x3), region = 87 }
 0xc01   :  { %1327 = vsyncpa [#allocation3], 1 }
 0xc02   :  { %1329 = vsyncpa [#allocation3 + $0x1], 1 }

</bundles_post_ra>
